<compile_context>
chip_gen: v7x
topology: tpu7x:2x2x1
jax: 0.10.0
libtpu: 0.0.40
codegen_flags: <defaults>
</compile_context>

<pallas_src>
import functools

import jax
import jax.numpy as jnp
from jax.experimental import pallas as pl
from jax.experimental.pallas import tpu as pltpu


def _round_up(x, m):
    return ((x + m - 1) // m) * m


def _pick_n_tile(np_, max_tile=512):
    # np_ is a multiple of 128; return the largest multiple-of-128 divisor <= max_tile.
    for t in range(max_tile, 0, -128):
        if np_ % t == 0:
            return t
    return 128


def _pick_b_tile(b):
    # Full-dim block for small batches: no batch padding / no x copy at all.
    if b <= 256:
        return b, b
    # Otherwise pick the tile (multiple of 16 for bf16 sublane packing) that
    # minimizes total padded rows, preferring larger tiles on ties.
    best_t, best_p = 256, _round_up(b, 256)
    for t in (256, 128, 64, 32, 16):
        p = _round_up(b, t)
        if p < best_p:
            best_t, best_p = t, p
    return best_t, best_p


def linear_fullk_kernel(x_ref, w_ref, b_ref, o_ref):
    """Grid = (N_tiles, M_tiles), no K axis.

    The bf16 weight block (Kp, Nt) index depends only on the outer (j) axis,
    so it stays VMEM-resident while the inner batch axis iterates.  The output
    tile is written exactly once: fused dot + bias, no scratch accumulator.
    """
    acc = jnp.dot(x_ref[...].astype(jnp.bfloat16), w_ref[...],
                  preferred_element_type=jnp.float32)
    o_ref[...] = acc + b_ref[...]


def linear_ktiled_kernel(x_ref, w_ref, b_ref, o_ref):
    """Fallback for very large input_dim.  Grid = (M, N, K); K trailing
    ('arbitrary').  The partial product is computed first, then either written
    (fused with the bias) or accumulated -- no init-then-RMW at k == 0."""
    k = pl.program_id(2)
    acc = jnp.dot(x_ref[...].astype(jnp.bfloat16), w_ref[...],
                  preferred_element_type=jnp.float32)

    @pl.when(k == 0)
    def _():
        o_ref[...] = acc + b_ref[...]

    @pl.when(k != 0)
    def _():
        o_ref[...] += acc


def prepare_linear_params(w, b, *, lane=128):
    """One-time parameter prep (call OUTSIDE the per-step forward).

    nn.Linear stores W as (N, K).  We store it transposed, zero-padded to
    (Kp, Np) with Kp = round_up(K, 128), Np = round_up(N, 128), and cast to
    bf16; the bias is stored as f32 (1, Np).  Zero padding does not change the
    matmul, and the padded output lanes are sliced off in the wrapper.
    """
    N, K = w.shape
    Kp = _round_up(max(K, 1), lane)
    Np = _round_up(max(N, 1), lane)
    w_t = (jnp.zeros((Kp, Np), dtype=jnp.float32)
           .at[:K, :N].set(jnp.transpose(w).astype(jnp.float32))
           .astype(jnp.bfloat16))
    b2d = jnp.zeros((1, Np), dtype=jnp.float32).at[0, :N].set(b.astype(jnp.float32))
    return w_t, b2d


@functools.partial(jax.jit, static_argnames=("num_classes",))
def input_classifier_forward(x, w_t, b2d, *, num_classes):
    """x: (B, C, H, W) f32; w_t: (Kp, Np) bf16 pre-transposed/padded; b2d: (1, Np) f32.

    Returns (B, num_classes) = flatten(x) @ W.T + b  (matches nn.Linear), with
    bf16 operands and f32 accumulation on the MXU.
    """
    B = x.shape[0]
    x2d = x.reshape(B, -1).astype(jnp.float32)      # flatten (plain-JAX glue)
    K = x2d.shape[1]
    Kp, Np = w_t.shape
    assert Kp == _round_up(K, 128), "input_dim mismatch with prepared weight"

    # ---- tiling ------------------------------------------------------------
    Nt = _pick_n_tile(Np)          # divides Np exactly -> never over-pads N
    Bt, Bp = _pick_b_tile(B)

    # Pad x only if strictly necessary (tiled batch, or K not a 128-multiple).
    x_p = x2d
    if (Bp, Kp) != (B, K):
        x_p = jnp.zeros((Bp, Kp), dtype=jnp.float32).at[:B, :K].set(x2d)

    # ---- path selection ------------------------------------------------------
    # Full-K resident weight whenever the double-buffered working set fits a
    # conservative ~28 MiB budget (true for any realistic classifier head).
    fullk_working_set = 2 * (Bt * Kp * 4 + Kp * Nt * 2 + Bt * Nt * 4 + Nt * 4)
    use_fullk = fullk_working_set <= 28 * 1024 * 1024

    if use_fullk:
        grid = (Np // Nt, Bp // Bt)          # j outer, i inner -> weight resident over i
        kernel = linear_fullk_kernel
        in_specs = [
            pl.BlockSpec((Bt, Kp), lambda j, i: (i, 0)),   # x slab (full K)
            pl.BlockSpec((Kp, Nt), lambda j, i: (0, j)),   # bf16 weight, resident
            pl.BlockSpec((1, Nt), lambda j, i: (0, j)),    # bias
        ]
        out_specs = pl.BlockSpec((Bt, Nt), lambda j, i: (i, j))
        dim_sem = ("parallel", "parallel")
        working_set = fullk_working_set
    else:
        # K-tiled fallback for very large input_dim.
        tk = next(t for t in (2048, 1024, 512, 256, 128) if Kp % t == 0)
        grid = (Bp // Bt, Np // Nt, Kp // tk)
        kernel = linear_ktiled_kernel
        in_specs = [
            pl.BlockSpec((Bt, tk), lambda i, j, k: (i, k)),
            pl.BlockSpec((tk, Nt), lambda i, j, k: (k, j)),
            pl.BlockSpec((1, Nt), lambda i, j, k: (0, j)),
        ]
        out_specs = pl.BlockSpec((Bt, Nt), lambda i, j, k: (i, j))
        dim_sem = ("parallel", "parallel", "arbitrary")
        working_set = 2 * (Bt * tk * 4 + tk * Nt * 2 + Bt * Nt * 4 + Nt * 4)

    # VMEM limit from the actual working set (+50% headroom); cap at 32 MiB so
    # it also fits v7x scoped VMEM.  v5e/v6e could raise this for huge K.
    vmem_limit = int(min(max(3 * working_set // 2, 16 * 1024 * 1024),
                         32 * 1024 * 1024))

    out = pl.pallas_call(
        kernel,
        out_shape=jax.ShapeDtypeStruct((Bp, Np), jnp.float32),
        grid_spec=pltpu.PrefetchScalarGridSpec(
            num_scalar_prefetch=0,
            grid=grid,
            in_specs=in_specs,
            out_specs=out_specs,
        ),
        compiler_params=pltpu.CompilerParams(
            dimension_semantics=dim_sem,
            vmem_limit_bytes=vmem_limit,
        ),
    )(x_p, w_t, b2d)

    # Slice the lane/sublane padding back off.
    return out[:B, :num_classes]


if __name__ == "__main__":
    # Small shapes consistent with the module: x = (B, C, H, W), input_dim = C*H*W.
    B, C, H, W = 2, 4, 16, 16
    input_dim = C * H * W        # 1024
    num_classes = 10

    key = jax.random.PRNGKey(0)
    kx, kw, kb = jax.random.split(key, 3)

    x = jax.random.normal(kx, (B, C, H, W), dtype=jnp.float32)
    # PyTorch Linear parameter shapes: weight (out, in), bias (out,)
    weight = jax.random.normal(kw, (num_classes, input_dim), dtype=jnp.float32) * 0.02
    bias = jax.random.normal(kb, (num_classes,), dtype=jnp.float32) * 0.01

    # One-time param prep (transpose + pad + bf16 cast), then the Pallas forward.
    w_t, b2d = prepare_linear_params(weight, bias)
    out = input_classifier_forward(x, w_t, b2d, num_classes=num_classes)
    out = jax.block_until_ready(out)
    assert out.shape == (B, num_classes)

    x2d = x.reshape(B, -1)
    # Matched-precision reference (bf16 operands, f32 accumulation): tight check.
    ref_bf16 = (x2d.astype(jnp.bfloat16).astype(jnp.float32)
                @ weight.astype(jnp.bfloat16).astype(jnp.float32).T) + bias
    assert jnp.allclose(out, ref_bf16, atol=1e-3, rtol=1e-3)
    # Exact f32 reference: documents the bf16 weight/activation approximation.
    ref_f32 = x2d @ weight.T + bias
    assert jnp.allclose(out, ref_f32, atol=2e-2, rtol=2e-2)

    print("KERNEL_OK")
</pallas_src>

<mosaic_0001>
module attributes {stable_mosaic.version = 11 : i64} {
  func.func @linear_fullk_kernel(%arg0: i32, %arg1: i32, %arg2: memref<2x1024xf32, #tpu.memory_space<vmem>>, %arg3: memref<1024x128xbf16, #tpu.memory_space<vmem>>, %arg4: memref<1x128xf32, #tpu.memory_space<vmem>>, %arg5: memref<2x128xf32, #tpu.memory_space<vmem>>) attributes {dimension_semantics = [#tpu.dimension_semantics<parallel>, #tpu.dimension_semantics<parallel>], iteration_bounds = array<i64: 1, 1>, scalar_prefetch = 0 : i64, scratch_operands = 0 : i64, tpu.core_type = #tpu.core_type<tc>, window_params = [{transform_indices = @transform_0, window_bounds = array<i64: 2, 1024>}, {transform_indices = @transform_1, window_bounds = array<i64: 1024, 128>}, {transform_indices = @transform_2, window_bounds = array<i64: 1, 128>}, {transform_indices = @transform_3, window_bounds = array<i64: 2, 128>}]} {
    %c0 = arith.constant 0 : index
    %c0_0 = arith.constant 0 : index
    %0 = vector.load %arg2[%c0, %c0_0] : memref<2x1024xf32, #tpu.memory_space<vmem>>, vector<2x1024xf32>
    %1 = arith.truncf %0 : vector<2x1024xf32> to vector<2x1024xbf16>
    %c0_1 = arith.constant 0 : index
    %c0_2 = arith.constant 0 : index
    %2 = vector.load %arg3[%c0_1, %c0_2] : memref<1024x128xbf16, #tpu.memory_space<vmem>>, vector<1024x128xbf16>
    %cst = arith.constant dense<0.000000e+00> : vector<2x128xf32>
    %3 = tpu.matmul %1, %2, %cst {dimension_numbers = #tpu.dot_dimension_numbers<[1], [0], [0], [1], [0, 0, 1, 1], [], []>} : vector<2x1024xbf16>, vector<1024x128xbf16>, vector<2x128xf32> -> vector<2x128xf32>
    %c0_3 = arith.constant 0 : index
    %c0_4 = arith.constant 0 : index
    %4 = vector.load %arg4[%c0_3, %c0_4] : memref<1x128xf32, #tpu.memory_space<vmem>>, vector<1x128xf32>
    %5 = vector.broadcast %4 : vector<1x128xf32> to vector<2x128xf32>
    %6 = arith.addf %3, %5 : vector<2x128xf32>
    %c0_5 = arith.constant 0 : index
    %c0_6 = arith.constant 0 : index
    %7 = vector.load %arg5[%c0_5, %c0_6] : memref<2x128xf32, #tpu.memory_space<vmem>>, vector<2x128xf32>
    tpu.vector_store %arg5[%c0_5, %c0_6], %6 {strides = array<i32>} : memref<2x128xf32, #tpu.memory_space<vmem>>, vector<2x128xf32>,
    return
  }
  func.func @transform_0(%arg0: i32, %arg1: i32) -> (i32, i32) {
    %c0_i32 = arith.constant 0 : i32
    %c0_i32_0 = arith.constant 0 : i32
    return %arg1, %c0_i32 : i32, i32
  }
  func.func @transform_1(%arg0: i32, %arg1: i32) -> (i32, i32) {
    %c0_i32 = arith.constant 0 : i32
    %c0_i32_0 = arith.constant 0 : i32
    return %c0_i32, %arg0 : i32, i32
  }
  func.func @transform_2(%arg0: i32, %arg1: i32) -> (i32, i32) {
    %c0_i32 = arith.constant 0 : i32
    %c0_i32_0 = arith.constant 0 : i32
    return %c0_i32, %arg0 : i32, i32
  }
  func.func @transform_3(%arg0: i32, %arg1: i32) -> (i32, i32) {
    %c0_i32 = arith.constant 0 : i32
    return %arg1, %arg0 : i32, i32
  }
}

</mosaic_0001>

<bundles_post_ra>
// kernel: input_classifier_forward.1
= control target key start
LH: loop header
LB: loop body
LE: loop exit
PB: predicated region body
PF: predicated region fallthrough
CT: control target
= control target key end

     0   :  { %8 = vsyncpa [#allocation3], 0  ;;  %s1115_s0 = inlined_call_operand.vmem [shape: f32[2,1024], index: 0, kind: input, shape index: {}]   ;;  %s1116_s1 = inlined_call_operand.hbm [shape: bf16[1024,128], index: 1, kind: input, shape index: {}]   ;;  %s1117_s2 = inlined_call_operand.vmem [shape: f32[1,128], index: 2, kind: input, shape index: {}]   ;;  %s1118_s3 = inlined_call_operand.hbm [shape: f32[2,128], index: 3, kind: output, shape index: {}]  }
   0x1   :  { %9 = vsyncpa [#allocation4], 0  ;;  %s1051_s12 = smov [#allocation2]   ;;  %s1003_s16 = scalar_lea.hbm %s1116_s1, 8192 }
   0x2   :  { %s17_s13 = sshll.u32 %s1051_s12, 4  ;;  %p1004_p0 = scmp.ne.s32.totalorder %s1116_s1, %s1003_s16  ;;  %s18_s13 = int_to_ptr.vmem [resolvable:$true] %s17_s13 }
   0x3   :  { %p1007_p1 = scmp.lt.u32.totalorder %s1003_s16, %s1116_s1 }
   0x5   :  { %p1009_p2 = pnand %p1007_p1, %p1004_p0 }
   0x7   :  { %1012 = shalt.err (!%p1009_p2)
}
   0x8   :  { %s1013_s21 = scalar_lea.vmem %s18_s13, 8192  ;;  %p1018_p4 = scmp.lt.s32.totalorder %s18_s13, %s18_s13 }
   0x9   :  { %p1014_p3 = scmp.ne.s32.totalorder %s18_s13, %s1013_s21  ;;  %p1019_p5 = scmp.lt.s32.totalorder %s1013_s21, %s1013_s21 }
   0xb   :  { %p1020_p6 = por %p1019_p5, %p1018_p4 }
   0xd   :  { %p1021_p7 = pnand %p1020_p6, %p1014_p3 }
   0xf   :  { %1024 = shalt.err (!%p1021_p7)
}
  0x10   :  { %s1052_s22 = smov 64   ;;  %s1053_s23 = smov 4  }
  0x11   :  { %23 = dma.hbm_to_vmem [thread:$0]  %s1116_s1, 8192, %s18_s13, [#allocation3], %s1052_s22, %s1052_s22, %s1053_s23  }
  0x12   :  { %1047 = dma.done.wait [#allocation3], 8192  }
  0x13   :  { %1048 = vsyncadd [#allocation3], 4294959104  ;;  %v937_v0 = vld [vmem:[#allocation2 + $0x40] sm:$0xff]   ;;  %v941_v4 = vld [vmem:[#allocation2 + $0x48] sm:$0xff]   ;;  %v1054_v22 = vmov 1983009808   ;;  %v38_v24 = vlaneseq }
  0x14   :  { %v938_v1 = vld [vmem:[#allocation2 + $0xc0] sm:$0xff]   ;;  %844 = vmatprep.subr.bf16.mxu0 %v937_v0  ;;  %v942_v5 = vld [vmem:[#allocation2 + $0xc8] sm:$0xff]   ;;  %v945_v8 = vld [vmem:[#allocation2 + $0x50] sm:$0xff]   ;;  %v36_v23 = vunpack.c.l.s4 %v1054_v22  ;;  %s1055_s30 = smov [#allocation5]  }
  0x15   :  { %v939_v2 = vld [vmem:[#allocation2] sm:$0xff]   ;;  %866 = vmatprep.subr.bf16.mxu1 %v938_v1  ;;  %v943_v6 = vld [vmem:[#allocation2 + $0x8] sm:$0xff]   ;;  %v946_v9 = vld [vmem:[#allocation2 + $0xd0] sm:$0xff]   ;;  %v39_v30 = vshrl.u32 %v38_v24, 7 }
  0x16   :  { %v940_v3 = vld [vmem:[#allocation2 + $0x80] sm:$0xff]   ;;  %845 = vmatpush3.bf16.msra.mxu0 %v939_v2  ;;  %v944_v7 = vld [vmem:[#allocation2 + $0x88] sm:$0xff]   ;;  %v947_v10 = vld [vmem:[#allocation2 + $0x10] sm:$0xff]   ;;  %v37_v29 = vunpack.c.0.s8 %v36_v23 }
  0x17   :  { %867 = vmatpush3.bf16.msra.mxu1 %v940_v3  ;;  %846 = vmatprep.subr.bf16.mxu0 %v941_v4  ;;  %v948_v11 = vld [vmem:[#allocation2 + $0x90] sm:$0xff]   ;;  %v949_v12 = vld [vmem:[#allocation2 + $0x58] sm:$0xff]   ;;  %v953_v16 = vld [vmem:[#allocation2 + $0x60] sm:$0xff]  }
  0x18   :  { %868 = vmatprep.subr.bf16.mxu1 %v942_v5  ;;  %v950_v13 = vld [vmem:[#allocation2 + $0xd8] sm:$0xff]   ;;  %v954_v17 = vld [vmem:[#allocation2 + $0xe0] sm:$0xff]   ;;  %v957_v20 = vld [vmem:[#allocation2 + $0x68] sm:$0xff]   ;;  %v1088_v35 = vsub.s32 %v37_v29, %v39_v30 }
  0x19   :  { %v951_v14 = vld [vmem:[#allocation2 + $0x18] sm:$0xff]   ;;  %v955_v18 = vld [vmem:[#allocation2 + $0x20] sm:$0xff]   ;;  %v958_v21 = vld [vmem:[#allocation2 + $0xe8] sm:$0xff]  }
  0x1a   :  { %847 = vmatpush3.bf16.msra.mxu0 %v943_v6  ;;  %v952_v15 = vld [vmem:[#allocation2 + $0x98] sm:$0xff]   ;;  %v956_v19 = vld [vmem:[#allocation2 + $0xa0] sm:$0xff]   ;;  %v959_v25 = vld [vmem:[#allocation2 + $0x28] sm:$0xff]  }
  0x1b   :  { %869 = vmatpush3.bf16.msra.mxu1 %v944_v7  ;;  %848 = vmatprep.subr.bf16.mxu0 %v945_v8  ;;  %v960_v26 = vld [vmem:[#allocation2 + $0xa8] sm:$0xff]   ;;  %v961_v27 = vld [vmem:[#allocation2 + $0x70] sm:$0xff]   ;;  %v965_v33 = vld [vmem:[#allocation2 + $0x78] sm:$0xff]  }
  0x1c   :  { %870 = vmatprep.subr.bf16.mxu1 %v946_v9  ;;  %v962_v28 = vld [vmem:[#allocation2 + $0xf0] sm:$0xff]   ;;  %v966_v34 = vld [vmem:[#allocation2 + $0xf8] sm:$0xff]   ;;  %v30_v38 = vld [vmem:[%s1115_s0] sm:$0xff] }
  0x1d   :  { %v963_v31 = vld [vmem:[#allocation2 + $0x30] sm:$0xff]   ;;  %v967_v36 = vld [vmem:[#allocation2 + $0x38] sm:$0xff]   ;;  %v41_v39 = vrot.slane %v30_v38, %v1088_v35  ;;  %v34_v40 = vcombine.high %v30_v38, %v30_v38  ;;  %v970_v41 = vld [vmem:[#allocation2 + $0x140] sm:$0xff]  }
  0x1e   :  { %849 = vmatpush3.bf16.msra.mxu0 %v947_v10  ;;  %v964_v32 = vld [vmem:[#allocation2 + $0xb0] sm:$0xff]   ;;  %v968_v37 = vld [vmem:[#allocation2 + $0xb8] sm:$0xff]   ;;  %v971_v42 = vld [vmem:[#allocation2 + $0x1c0] sm:$0xff]  }
  0x1f   :  { %871 = vmatpush3.bf16.msra.mxu1 %v948_v11  ;;  %850 = vmatprep.subr.bf16.mxu0 %v949_v12  ;;  %v49_v43 = vcombine.high %v41_v39, %v41_v39  ;;  %v48_v44 = vrot.slane %v34_v40, %v1088_v35  ;;  %v76_v45 = vpack.c.bf16 %v41_v39, %v41_v39  ;;  %v972_v48 = vld [vmem:[#allocation2 + $0x100] sm:$0xff]   ;;  %v974_v50 = vld [vmem:[#allocation2 + $0x148] sm:$0xff]   ;;  %v978_v55 = vld [vmem:[#allocation2 + $0x150] sm:$0xff]  }
  0x20   :  { %872 = vmatprep.subr.bf16.mxu1 %v950_v13  ;;  %v973_v52 = vld [vmem:[#allocation2 + $0x180] sm:$0xff]   ;;  %v975_v53 = vld [vmem:[#allocation2 + $0x1c8] sm:$0xff]   ;;  %v979_v57 = vld [vmem:[#allocation2 + $0x1d0] sm:$0xff]  }
  0x21   :  { %v77_v46 = vpack.c.bf16 %v49_v43, %v49_v43  ;;  %v50_v47 = vcombine.high %v48_v44, %v48_v44  ;;  %v78_v49 = vpack.c.bf16 %v48_v44, %v48_v44  ;;  %v976_v54 = vld [vmem:[#allocation2 + $0x108] sm:$0xff]   ;;  %v980_v58 = vld [vmem:[#allocation2 + $0x110] sm:$0xff]   ;;  %v982_v59 = vld [vmem:[#allocation2 + $0x158] sm:$0xff]  }
  0x22   :  { %851 = vmatpush3.bf16.msra.mxu0 %v951_v14  ;;  %v977_v56 = vld [vmem:[#allocation2 + $0x188] sm:$0xff]   ;;  %v981_v60 = vld [vmem:[#allocation2 + $0x190] sm:$0xff]   ;;  %v983_v61 = vld [vmem:[#allocation2 + $0x1d8] sm:$0xff]  }
  0x23   :  { %873 = vmatpush3.bf16.msra.mxu1 %v952_v15  ;;  %852 = vmatprep.subr.bf16.mxu0 %v953_v16  ;;  %v79_v51 = vpack.c.bf16 %v50_v47, %v50_v47  ;;  %v984_v62 = vld [vmem:[#allocation2 + $0x118] sm:$0xff]   ;;  %v986_v63 = vld [vmem:[#allocation2 + $0x160] sm:$0xff]   ;;  %v990_v3 = vld [vmem:[#allocation2 + $0x168] sm:$0xff]  }
  0x24   :  { %874 = vmatprep.subr.bf16.mxu1 %v954_v17  ;;  %635 = vmatprep.mubr.bf16.mxu0 %v77_v46  ;;  %v985_v0 = vld [vmem:[#allocation2 + $0x198] sm:$0xff]   ;;  %v987_v1 = vld [vmem:[#allocation2 + $0x1e0] sm:$0xff]   ;;  %v991_v5 = vld [vmem:[#allocation2 + $0x1e8] sm:$0xff]  }
  0x25   :  { %675 = vmatprep.mubr.bf16.mxu1 %v79_v51  ;;  %v988_v2 = vld [vmem:[#allocation2 + $0x120] sm:$0xff]   ;;  %v992_v6 = vld [vmem:[#allocation2 + $0x128] sm:$0xff]   ;;  %v994_v7 = vld [vmem:[#allocation2 + $0x170] sm:$0xff]  }
  0x26   :  { %853 = vmatpush3.bf16.msra.mxu0 %v955_v18  ;;  %v989_v4 = vld [vmem:[#allocation2 + $0x1a0] sm:$0xff]   ;;  %v993_v8 = vld [vmem:[#allocation2 + $0x1a8] sm:$0xff]   ;;  %v995_v9 = vld [vmem:[#allocation2 + $0x1f0] sm:$0xff]  }
  0x27   :  { %875 = vmatpush3.bf16.msra.mxu1 %v956_v19  ;;  %854 = vmatprep.subr.bf16.mxu0 %v957_v20  ;;  %v996_v10 = vld [vmem:[#allocation2 + $0x130] sm:$0xff]   ;;  %v998_v11 = vld [vmem:[#allocation2 + $0x178] sm:$0xff]   ;;  %v31_v14 = vld [vmem:[%s1115_s0 + $0x8] sm:$0xff] }
  0x28   :  { %876 = vmatprep.subr.bf16.mxu1 %v958_v21  ;;  %v997_v12 = vld [vmem:[#allocation2 + $0x1b0] sm:$0xff]   ;;  %v999_v13 = vld [vmem:[#allocation2 + $0x1f8] sm:$0xff]   ;;  %v58_v16 = vrot.slane %v31_v14, %v1088_v35  ;;  %v51_v17 = vcombine.high %v31_v14, %v31_v14 }
  0x29   :  { %v1000_v15 = vld [vmem:[#allocation2 + $0x138] sm:$0xff]  }
  0x2a   :  { %855 = vmatpush3.bf16.msra.mxu0 %v959_v25  ;;  %v1001_v18 = vld [vmem:[#allocation2 + $0x1b8] sm:$0xff]   ;;  %v66_v19 = vcombine.high %v58_v16, %v58_v16  ;;  %v65_v20 = vrot.slane %v51_v17, %v1088_v35  ;;  %v80_v21 = vpack.c.bf16 %v58_v16, %v58_v16 }
  0x2b   :  { %877 = vmatpush3.bf16.msra.mxu1 %v960_v26  ;;  %856 = vmatprep.subr.bf16.mxu0 %v961_v27  ;;  %v779_v27 = vld [vmem:[%s1117_s2] ss:$0 sm:$0xff]  ;;  %s770_s2 = sshll.u32 %s1055_s30, 4  ;;  %s771_s2 = int_to_ptr.vmem [resolvable:$true] %s770_s2 }
  0x2c   :  { %878 = vmatprep.subr.bf16.mxu1 %v962_v28  ;;  %v81_v22 = vpack.c.bf16 %v66_v19, %v66_v19  ;;  %v67_v23 = vcombine.high %v65_v20, %v65_v20  ;;  %v82_v24 = vpack.c.bf16 %v65_v20, %v65_v20  ;;  %s1025_s4 = scalar_lea.vmem %s771_s2, 32  ;;  %p1030_p9 = scmp.lt.s32.totalorder %s771_s2, %s771_s2 }
  0x2d   :  { %p1026_p8 = scmp.ne.s32.totalorder %s771_s2, %s1025_s4  ;;  %p1031_p10 = scmp.lt.s32.totalorder %s1025_s4, %s1025_s4 }
  0x2e   :  { %857 = vmatpush3.bf16.msra.mxu0 %v963_v31  ;;  %v83_v25 = vpack.c.bf16 %v67_v23, %v67_v23 }
  0x2f   :  { %879 = vmatpush3.bf16.msra.mxu1 %v964_v32  ;;  %858 = vmatprep.subr.bf16.mxu0 %v965_v33  ;;  %p1032_p11 = por %p1031_p10, %p1030_p9 }
  0x30   :  { %880 = vmatprep.subr.bf16.mxu1 %v966_v34 }
  0x31   :  { %p1033_p12 = pnand %p1032_p11, %p1026_p8 }
  0x32   :  { %859 = vmatpush3.bf16.msra.mxu0 %v967_v36 }
  0x33   :  { %881 = vmatpush3.bf16.msra.mxu1 %v968_v37  ;;  %888 = vmatprep.subr.bf16.mxu0 %v970_v41 }
  0x34   :  { %910 = vmatprep.subr.bf16.mxu1 %v971_v42 }
  0x35   :  { %636 = vmatmul.mubr.bf16.vlgmr.msra.gmra.mrb[0].mxu0 %v76_v45 }
  0x36   :  { %889 = vmatpush3.bf16.msra.mxu0 %v972_v48  ;;  %676 = vmatmul.mubr.bf16.vlgmr.msra.gmra.mrb[0].mxu1 %v78_v49 }
  0x37   :  { %890 = vmatprep.subr.bf16.mxu0 %v974_v50  ;;  %911 = vmatpush3.bf16.msra.mxu1 %v973_v52 }
  0x38   :  { %912 = vmatprep.subr.bf16.mxu1 %v975_v53  ;;  %715 = vmatprep.mubr.bf16.mxu0 %v81_v22 }
  0x39   :  { %755 = vmatprep.mubr.bf16.mxu1 %v83_v25 }
  0x3a   :  { %891 = vmatpush3.bf16.msra.mxu0 %v976_v54 }
  0x3b   :  { %892 = vmatprep.subr.bf16.mxu0 %v978_v55  ;;  %913 = vmatpush3.bf16.msra.mxu1 %v977_v56 }
  0x3c   :  { %914 = vmatprep.subr.bf16.mxu1 %v979_v57 }
  0x3e   :  { %893 = vmatpush3.bf16.msra.mxu0 %v980_v58 }
  0x3f   :  { %894 = vmatprep.subr.bf16.mxu0 %v982_v59  ;;  %915 = vmatpush3.bf16.msra.mxu1 %v981_v60 }
  0x40   :  { %916 = vmatprep.subr.bf16.mxu1 %v983_v61 }
  0x42   :  { %895 = vmatpush3.bf16.msra.mxu0 %v984_v62 }
  0x43   :  { %896 = vmatprep.subr.bf16.mxu0 %v986_v63  ;;  %917 = vmatpush3.bf16.msra.mxu1 %v985_v0 }
  0x44   :  { %918 = vmatprep.subr.bf16.mxu1 %v987_v1 }
  0x46   :  { %897 = vmatpush3.bf16.msra.mxu0 %v988_v2 }
  0x47   :  { %898 = vmatprep.subr.bf16.mxu0 %v990_v3  ;;  %919 = vmatpush3.bf16.msra.mxu1 %v989_v4 }
  0x48   :  { %920 = vmatprep.subr.bf16.mxu1 %v991_v5 }
  0x4a   :  { %899 = vmatpush3.bf16.msra.mxu0 %v992_v6 }
  0x4b   :  { %900 = vmatprep.subr.bf16.mxu0 %v994_v7  ;;  %921 = vmatpush3.bf16.msra.mxu1 %v993_v8 }
  0x4c   :  { %922 = vmatprep.subr.bf16.mxu1 %v995_v9 }
  0x4e   :  { %901 = vmatpush3.bf16.msra.mxu0 %v996_v10 }
  0x4f   :  { %902 = vmatprep.subr.bf16.mxu0 %v998_v11  ;;  %923 = vmatpush3.bf16.msra.mxu1 %v997_v12 }
  0x50   :  { %924 = vmatprep.subr.bf16.mxu1 %v999_v13 }
  0x52   :  { %903 = vmatpush3.bf16.msra.mxu0 %v1000_v15 }
  0x53   :  { %925 = vmatpush3.bf16.msra.mxu1 %v1001_v18 }
  0x55   :  { %716 = vmatmul.mubr.bf16.vlgmr.msra.gmra.mrb[4].mxu0 %v80_v21 }
  0x56   :  { %756 = vmatmul.mubr.bf16.vlgmr.msra.gmra.mrb[4].mxu1 %v82_v24 }
 0x108   :  { %v860_v26 = vpop.f32.mrb[0].mxu0 }
 0x109   :  { %v861_v28 = vpop.f32.mrb[1].mxu0  ;;  %v882_v29 = vpop.f32.mrb[0].mxu1 }
 0x10a   :  { %v862_v30 = vadd.f32 %v861_v28, %v860_v26  ;;  %v863_v31 = vpop.f32.mrb[2].mxu0  ;;  %v883_v32 = vpop.f32.mrb[1].mxu1 }
 0x10b   :  { %v864_v33 = vpop.f32.mrb[3].mxu0  ;;  %v884_v35 = vadd.f32 %v883_v32, %v882_v29  ;;  %v885_v36 = vpop.f32.mrb[2].mxu1 }
 0x10c   :  { %v638_v34 = vadd.f32 %v862_v30, %v779_v27  ;;  %v886_v37 = vpop.f32.mrb[3].mxu1 }
 0x10e   :  { %v678_v38 = vadd.f32 %v884_v35, %v638_v34 }
 0x128   :  { %v904_v39 = vpop.f32.mrb[4].mxu0 }
 0x129   :  { %v905_v40 = vpop.f32.mrb[5].mxu0  ;;  %v926_v41 = vpop.f32.mrb[4].mxu1 }
 0x12a   :  { %v906_v42 = vadd.f32 %v905_v40, %v904_v39  ;;  %v907_v43 = vpop.f32.mrb[6].mxu0  ;;  %v927_v44 = vpop.f32.mrb[5].mxu1 }
 0x12b   :  { %v908_v45 = vpop.f32.mrb[7].mxu0  ;;  %v928_v47 = vadd.f32 %v927_v44, %v926_v41  ;;  %v929_v48 = vpop.f32.mrb[6].mxu1 }
 0x12c   :  { %v718_v46 = vadd.f32 %v906_v42, %v678_v38  ;;  %v930_v49 = vpop.f32.mrb[7].mxu1 }
 0x12e   :  { %v758_v50 = vadd.f32 %v928_v47, %v718_v46 }
 0x130   :  { %763 = vst [vmem:[#allocation5] sm:$0x3] %v758_v50 }
 0x131   :  { %1036 = shalt.err (!%p1033_p12)
}
 0x132   :  { %s1037_s7 = scalar_lea.hbm %s1118_s3, 32 }
 0x133   :  { %p1038_p13 = scmp.ne.s32.totalorder %s1118_s3, %s1037_s7  ;;  %p1041_p0 = scmp.lt.u32.totalorder %s1037_s7, %s1118_s3 }
 0x135   :  { %p1043_p1 = pnand %p1041_p0, %p1038_p13 }
 0x137   :  { %1046 = shalt.err (!%p1043_p1)
}
 0x138   :  { %773 = dma.vmem_to_hbm [thread:$0]  %s771_s2, 32, %s1118_s3, [#allocation4]  }
 0x139   :  { %1049 = dma.done.wait [#allocation4], 32  }
 0x13a   :  { %1050 = vsyncadd [#allocation4], 4294967264 }
 0x13b   :  { %777 = vsyncpa [#allocation3], 1 }
 0x13c   :  { %778 = vsyncpa [#allocation4], 1 }

</bundles_post_ra>
